<compile_context>
chip_gen: v7x
topology: tpu7x:2x2x1
jax: 0.10.0
libtpu: 0.0.40
codegen_flags: <defaults>
</compile_context>

<pallas_src>
import jax
import jax.numpy as jnp
from jax.experimental import pallas as pl
from jax.experimental.pallas import tpu as pltpu


LANE = 128     # TPU lane width (last-dim alignment for dense stores)
SUBLANE = 8    # f32 sublane multiple for the batch tile


def _round_up(n, m):
    return ((n + m - 1) // m) * m


# ----------------------------- Pallas kernel -------------------------------

def _mlp_kernel(x_ref, w1_ref, b1_ref, w2_ref, b2_ref, w3_ref, b3_ref, o_ref):
    """Fused MLP: relu(x @ W1 + b1) @ W2 + b2 -> relu -> @ W3 + b3.

    x is loaded f32 and cast to bf16 for the MXU; weights are bf16;
    accumulation, bias add and ReLU run in f32 on the VPU.
    """
    x = x_ref[...].astype(jnp.bfloat16)                               # [tb, d_in]

    h = jnp.dot(x, w1_ref[...], preferred_element_type=jnp.float32)   # f32 acc
    h = jnp.maximum(h + b1_ref[...], 0.0)                             # bias + ReLU
    # nn.Dropout(p): identity in eval mode (inference semantics).
    # TODO(synk): training-mode dropout (stochastic mask via pltpu.prng_random_bits) not emitted.
    h = h.astype(jnp.bfloat16)

    h = jnp.dot(h, w2_ref[...], preferred_element_type=jnp.float32)
    h = jnp.maximum(h + b2_ref[...], 0.0)
    h = h.astype(jnp.bfloat16)

    o = jnp.dot(h, w3_ref[...], preferred_element_type=jnp.float32) + b3_ref[...]
    o_ref[...] = o.astype(o_ref.dtype)                                # lane-dense f32 store


# --------------------------- kernel param prep ------------------------------

def prepare_kernel_params(params):
    """Cast weights to bf16 for the MXU and pad the last layer to a lane-dense
    (multiple-of-128) output width.  Biases stay f32 (VPU add path).

    Returns (kernel_params, true_d_out)."""
    d_out = params["w3"].shape[1]
    d_out_p = _round_up(d_out, LANE)
    pad = d_out_p - d_out
    w3 = jnp.pad(params["w3"], ((0, 0), (0, pad)))
    b3 = jnp.pad(params["b3"], ((0, 0), (0, pad)))
    kparams = {
        "w1": params["w1"].astype(jnp.bfloat16),
        "b1": params["b1"].astype(jnp.float32),
        "w2": params["w2"].astype(jnp.bfloat16),
        "b2": params["b2"].astype(jnp.float32),
        "w3": w3.astype(jnp.bfloat16),
        "b3": b3.astype(jnp.float32),
    }
    return kparams, d_out


# ------------------------------- forward ------------------------------------

def meta_model_forward(x, kparams, d_out, *, tile_b=1024):
    """Run the MetaModel MLP forward pass with a single pallas_call.

    x:        [B, d_in] float32 (cast to bf16 inside the kernel)
    kparams:  output of prepare_kernel_params (bf16 weights, f32 biases,
              last layer padded to a multiple of 128 columns)
    d_out:    true (unpadded) output width
    tile_b:   batch tile (rows per grid step); large by default so the
              per-step pipeline overhead is amortized.
    """
    x = x.astype(jnp.float32)
    B, d_in = x.shape
    h1 = kparams["w1"].shape[1]
    h2 = kparams["w2"].shape[1]
    d_out_p = kparams["w3"].shape[1]

    # Clamp the tile for tiny batches, keep it a sublane multiple, and zero-pad
    # the batch so the grid divides evenly (ragged last tile).
    tile_b = max(SUBLANE, _round_up(min(tile_b, B), SUBLANE))
    B_pad = _round_up(B, tile_b)
    if B_pad != B:
        x = jnp.pad(x, ((0, B_pad - B), (0, 0)))

    grid = (B_pad // tile_b,)

    # x is tiled along batch; weights/biases have constant block indices, so the
    # pipeline keeps them resident in VMEM (no re-DMA per step).
    in_specs = [
        pl.BlockSpec((tile_b, d_in), lambda i: (i, 0)),        # x tile (streamed)
        pl.BlockSpec((d_in, h1),     lambda i: (0, 0)),        # W1
        pl.BlockSpec((1, h1),        lambda i: (0, 0)),        # b1
        pl.BlockSpec((h1, h2),       lambda i: (0, 0)),        # W2
        pl.BlockSpec((1, h2),        lambda i: (0, 0)),        # b2
        pl.BlockSpec((h2, d_out_p),  lambda i: (0, 0)),        # W3 (lane-padded)
        pl.BlockSpec((1, d_out_p),   lambda i: (0, 0)),        # b3 (lane-padded)
    ]
    out_specs = pl.BlockSpec((tile_b, d_out_p), lambda i: (i, 0))

    # Advisory cost estimate so XLA schedules/overlaps this call sensibly.
    flops = 2 * B_pad * (d_in * h1 + h1 * h2 + h2 * d_out_p)
    weight_bytes = sum(int(v.size) * v.dtype.itemsize for v in kparams.values())
    bytes_accessed = B_pad * d_in * 4 + B_pad * d_out_p * 4 + weight_bytes
    cost = pl.CostEstimate(flops=flops, transcendentals=0,
                           bytes_accessed=bytes_accessed)

    # Only raise the scoped-VMEM limit when the tiles actually need it
    # (v5e default is 16 MiB); cap at 64 MiB (v7x physical VMEM per core).
    x_tile_bytes = tile_b * d_in * 4
    out_tile_bytes = tile_b * d_out_p * 4
    vmem_need = 2 * (x_tile_bytes + out_tile_bytes) + weight_bytes + (1 << 20)
    cp_kwargs = {"dimension_semantics": ("parallel",)}
    if vmem_need > (16 << 20):
        cp_kwargs["vmem_limit_bytes"] = min(max(vmem_need, 32 << 20), 64 << 20)

    out = pl.pallas_call(
        _mlp_kernel,
        out_shape=jax.ShapeDtypeStruct((B_pad, d_out_p), jnp.float32),
        grid_spec=pl.GridSpec(
            grid=grid,
            in_specs=in_specs,
            out_specs=out_specs,
        ),
        compiler_params=pltpu.CompilerParams(**cp_kwargs),
        cost_estimate=cost,
    )(x, kparams["w1"], kparams["b1"], kparams["w2"], kparams["b2"],
      kparams["w3"], kparams["b3"])

    return out[:B, :d_out]


# --------------------------- parameter building -----------------------------

def init_meta_model_params(key, layer_dims):
    """Deterministic init matching nn.Linear default: U(-1/sqrt(fan_in), 1/sqrt(fan_in)).

    layer_dims: e.g. [in, h1, h2, out].  Weights are returned pre-transposed
    as [in_features, out_features] for the kernel's x @ W convention.
    """
    params = {}
    keys = jax.random.split(key, 2 * (len(layer_dims) - 1))
    for li in range(len(layer_dims) - 1):
        fan_in, fan_out = layer_dims[li], layer_dims[li + 1]
        bound = 1.0 / (fan_in ** 0.5)
        wk, bk = keys[2 * li], keys[2 * li + 1]
        # PyTorch weight is [out, in]; we store its transpose [in, out].
        w = jax.random.uniform(wk, (fan_in, fan_out), jnp.float32, -bound, bound)
        b = jax.random.uniform(bk, (1, fan_out), jnp.float32, -bound, bound)
        params[f"w{li + 1}"] = w
        params[f"b{li + 1}"] = b
    return params


# ------------------------------- references ---------------------------------

def reference_forward_bf16(x, params):
    """Plain-JAX reference following the kernel's bf16-input / f32-accum path."""
    w1 = params["w1"].astype(jnp.bfloat16)
    w2 = params["w2"].astype(jnp.bfloat16)
    w3 = params["w3"].astype(jnp.bfloat16)
    h = jnp.dot(x.astype(jnp.bfloat16), w1, preferred_element_type=jnp.float32)
    h = jnp.maximum(h + params["b1"], 0.0).astype(jnp.bfloat16)
    h = jnp.dot(h, w2, preferred_element_type=jnp.float32)
    h = jnp.maximum(h + params["b2"], 0.0).astype(jnp.bfloat16)
    return jnp.dot(h, w3, preferred_element_type=jnp.float32) + params["b3"]


def reference_forward_f32(x, params):
    """Pure-f32 reference of the original module (loose-tolerance sanity check)."""
    h = jnp.maximum(x @ params["w1"] + params["b1"], 0.0)
    h = jnp.maximum(h @ params["w2"] + params["b2"], 0.0)
    return h @ params["w3"] + params["b3"]


# --------------------------------- main --------------------------------------

if __name__ == "__main__":
    # Config analog:
    # config['model']['layers'] = [
    #   {'type': 'Linear', 'in_features': 32, 'out_features': 64, 'activation': 'ReLU', 'dropout': 0.1},
    #   {'type': 'Linear', 'in_features': 64, 'out_features': 64, 'activation': 'ReLU', 'dropout': 0.1},
    #   {'type': 'Linear', 'in_features': 64, 'out_features': 32},
    # ]
    layer_dims = [32, 64, 64, 32]

    key = jax.random.PRNGKey(0)
    pkey, xkey = jax.random.split(key)
    params = init_meta_model_params(pkey, layer_dims)
    kparams, d_out = prepare_kernel_params(params)

    # Case 1: small batch (single grid step, ragged batch padded internally).
    batch = 8
    x = jax.random.normal(xkey, (batch, layer_dims[0]), jnp.float32)
    out = jax.block_until_ready(meta_model_forward(x, kparams, d_out))
    assert out.shape == (batch, d_out)
    ref_b = reference_forward_bf16(x, params)
    ref_f = reference_forward_f32(x, params)
    assert jnp.allclose(out, ref_b, atol=5e-3, rtol=5e-3), "mismatch vs bf16-path reference"
    assert jnp.allclose(out, ref_f, atol=1e-1, rtol=1e-1), "mismatch vs f32 reference"

    # Case 2: exercise multiple grid steps + ragged last tile with a small tile.
    batch2 = 56  # not a multiple of tile_b -> padded to 64 -> grid=(4,)
    x2 = jax.random.normal(jax.random.fold_in(xkey, 1), (batch2, layer_dims[0]), jnp.float32)
    out2 = jax.block_until_ready(meta_model_forward(x2, kparams, d_out, tile_b=16))
    assert out2.shape == (batch2, d_out)
    ref2_b = reference_forward_bf16(x2, params)
    ref2_f = reference_forward_f32(x2, params)
    assert jnp.allclose(out2, ref2_b, atol=5e-3, rtol=5e-3), "mismatch vs bf16-path reference (case 2)"
    assert jnp.allclose(out2, ref2_f, atol=1e-1, rtol=1e-1), "mismatch vs f32 reference (case 2)"

    print("KERNEL_OK")
</pallas_src>

<mosaic_0001>
module attributes {stable_mosaic.version = 11 : i64} {
  func.func @_mlp_kernel(%arg0: i32, %arg1: memref<8x32xf32, #tpu.memory_space<vmem>>, %arg2: memref<32x64xbf16, #tpu.memory_space<vmem>>, %arg3: memref<1x64xf32, #tpu.memory_space<vmem>>, %arg4: memref<64x64xbf16, #tpu.memory_space<vmem>>, %arg5: memref<1x64xf32, #tpu.memory_space<vmem>>, %arg6: memref<64x128xbf16, #tpu.memory_space<vmem>>, %arg7: memref<1x128xf32, #tpu.memory_space<vmem>>, %arg8: memref<8x128xf32, #tpu.memory_space<vmem>>) attributes {dimension_semantics = [#tpu.dimension_semantics<parallel>], iteration_bounds = array<i64: 1>, scalar_prefetch = 0 : i64, scratch_operands = 0 : i64, tpu.core_type = #tpu.core_type<tc>, window_params = [{transform_indices = @transform_0, window_bounds = array<i64: 8, 32>}, {pipeline_mode = #tpu.pipeline_mode<synchronous>, transform_indices = @transform_1, window_bounds = array<i64: 32, 64>}, {pipeline_mode = #tpu.pipeline_mode<synchronous>, transform_indices = @transform_2, window_bounds = array<i64: 1, 64>}, {pipeline_mode = #tpu.pipeline_mode<synchronous>, transform_indices = @transform_3, window_bounds = array<i64: 64, 64>}, {pipeline_mode = #tpu.pipeline_mode<synchronous>, transform_indices = @transform_4, window_bounds = array<i64: 1, 64>}, {pipeline_mode = #tpu.pipeline_mode<synchronous>, transform_indices = @transform_5, window_bounds = array<i64: 64, 128>}, {pipeline_mode = #tpu.pipeline_mode<synchronous>, transform_indices = @transform_6, window_bounds = array<i64: 1, 128>}, {transform_indices = @transform_7, window_bounds = array<i64: 8, 128>}]} {
    %c0 = arith.constant 0 : index
    %c0_0 = arith.constant 0 : index
    %0 = vector.load %arg1[%c0, %c0_0] : memref<8x32xf32, #tpu.memory_space<vmem>>, vector<8x32xf32>
    %1 = arith.truncf %0 : vector<8x32xf32> to vector<8x32xbf16>
    %c0_1 = arith.constant 0 : index
    %c0_2 = arith.constant 0 : index
    %2 = vector.load %arg2[%c0_1, %c0_2] : memref<32x64xbf16, #tpu.memory_space<vmem>>, vector<32x64xbf16>
    %cst = arith.constant dense<0.000000e+00> : vector<8x64xf32>
    %3 = tpu.matmul %1, %2, %cst {dimension_numbers = #tpu.dot_dimension_numbers<[1], [0], [0], [1], [0, 0, 1, 1], [], []>} : vector<8x32xbf16>, vector<32x64xbf16>, vector<8x64xf32> -> vector<8x64xf32>
    %c0_3 = arith.constant 0 : index
    %c0_4 = arith.constant 0 : index
    %4 = vector.load %arg3[%c0_3, %c0_4] : memref<1x64xf32, #tpu.memory_space<vmem>>, vector<1x64xf32>
    %5 = vector.broadcast %4 : vector<1x64xf32> to vector<8x64xf32>
    %6 = arith.addf %3, %5 : vector<8x64xf32>
    %cst_5 = arith.constant 0.000000e+00 : f32
    %7 = vector.broadcast %cst_5 : f32 to vector<8x64xf32>
    %8 = arith.maximumf %6, %7 : vector<8x64xf32>
    %9 = arith.truncf %8 : vector<8x64xf32> to vector<8x64xbf16>
    %c0_6 = arith.constant 0 : index
    %c0_7 = arith.constant 0 : index
    %10 = vector.load %arg4[%c0_6, %c0_7] : memref<64x64xbf16, #tpu.memory_space<vmem>>, vector<64x64xbf16>
    %cst_8 = arith.constant dense<0.000000e+00> : vector<8x64xf32>
    %11 = tpu.matmul %9, %10, %cst_8 {dimension_numbers = #tpu.dot_dimension_numbers<[1], [0], [0], [1], [0, 0, 1, 1], [], []>} : vector<8x64xbf16>, vector<64x64xbf16>, vector<8x64xf32> -> vector<8x64xf32>
    %c0_9 = arith.constant 0 : index
    %c0_10 = arith.constant 0 : index
    %12 = vector.load %arg5[%c0_9, %c0_10] : memref<1x64xf32, #tpu.memory_space<vmem>>, vector<1x64xf32>
    %13 = vector.broadcast %12 : vector<1x64xf32> to vector<8x64xf32>
    %14 = arith.addf %11, %13 : vector<8x64xf32>
    %cst_11 = arith.constant 0.000000e+00 : f32
    %15 = vector.broadcast %cst_11 : f32 to vector<8x64xf32>
    %16 = arith.maximumf %14, %15 : vector<8x64xf32>
    %17 = arith.truncf %16 : vector<8x64xf32> to vector<8x64xbf16>
    %c0_12 = arith.constant 0 : index
    %c0_13 = arith.constant 0 : index
    %18 = vector.load %arg6[%c0_12, %c0_13] : memref<64x128xbf16, #tpu.memory_space<vmem>>, vector<64x128xbf16>
    %cst_14 = arith.constant dense<0.000000e+00> : vector<8x128xf32>
    %19 = tpu.matmul %17, %18, %cst_14 {dimension_numbers = #tpu.dot_dimension_numbers<[1], [0], [0], [1], [0, 0, 1, 1], [], []>} : vector<8x64xbf16>, vector<64x128xbf16>, vector<8x128xf32> -> vector<8x128xf32>
    %c0_15 = arith.constant 0 : index
    %c0_16 = arith.constant 0 : index
    %20 = vector.load %arg7[%c0_15, %c0_16] : memref<1x128xf32, #tpu.memory_space<vmem>>, vector<1x128xf32>
    %21 = vector.broadcast %20 : vector<1x128xf32> to vector<8x128xf32>
    %22 = arith.addf %19, %21 : vector<8x128xf32>
    %c0_17 = arith.constant 0 : index
    %c0_18 = arith.constant 0 : index
    %23 = vector.load %arg8[%c0_17, %c0_18] : memref<8x128xf32, #tpu.memory_space<vmem>>, vector<8x128xf32>
    tpu.vector_store %arg8[%c0_17, %c0_18], %22 {strides = array<i32>} : memref<8x128xf32, #tpu.memory_space<vmem>>, vector<8x128xf32>,
    return
  }
  func.func @transform_0(%arg0: i32) -> (i32, i32) {
    %c0_i32 = arith.constant 0 : i32
    %c0_i32_0 = arith.constant 0 : i32
    return %arg0, %c0_i32 : i32, i32
  }
  func.func @transform_1(%arg0: i32) -> (i32, i32) {
    %c0_i32 = arith.constant 0 : i32
    %c0_i32_0 = arith.constant 0 : i32
    %c0_i32_1 = arith.constant 0 : i32
    return %c0_i32, %c0_i32_0 : i32, i32
  }
  func.func @transform_2(%arg0: i32) -> (i32, i32) {
    %c0_i32 = arith.constant 0 : i32
    %c0_i32_0 = arith.constant 0 : i32
    %c0_i32_1 = arith.constant 0 : i32
    return %c0_i32, %c0_i32_0 : i32, i32
  }
  func.func @transform_3(%arg0: i32) -> (i32, i32) {
    %c0_i32 = arith.constant 0 : i32
    %c0_i32_0 = arith.constant 0 : i32
    %c0_i32_1 = arith.constant 0 : i32
    return %c0_i32, %c0_i32_0 : i32, i32
  }
  func.func @transform_4(%arg0: i32) -> (i32, i32) {
    %c0_i32 = arith.constant 0 : i32
    %c0_i32_0 = arith.constant 0 : i32
    %c0_i32_1 = arith.constant 0 : i32
    return %c0_i32, %c0_i32_0 : i32, i32
  }
  func.func @transform_5(%arg0: i32) -> (i32, i32) {
    %c0_i32 = arith.constant 0 : i32
    %c0_i32_0 = arith.constant 0 : i32
    %c0_i32_1 = arith.constant 0 : i32
    return %c0_i32, %c0_i32_0 : i32, i32
  }
  func.func @transform_6(%arg0: i32) -> (i32, i32) {
    %c0_i32 = arith.constant 0 : i32
    %c0_i32_0 = arith.constant 0 : i32
    %c0_i32_1 = arith.constant 0 : i32
    return %c0_i32, %c0_i32_0 : i32, i32
  }
  func.func @transform_7(%arg0: i32) -> (i32, i32) {
    %c0_i32 = arith.constant 0 : i32
    %c0_i32_0 = arith.constant 0 : i32
    return %arg0, %c0_i32 : i32, i32
  }
}

</mosaic_0001>

<bundles_post_ra>
// kernel: tpu_custom_call.1
= control target key start
LH: loop header
LB: loop body
LE: loop exit
PB: predicated region body
PF: predicated region fallthrough
CT: control target
= control target key end

     0   :  { %12 = vsyncpa [#allocation3], 0  ;;  %s667_s0 = inlined_call_operand.hbm [shape: f32[8,32], index: 0, kind: input, shape index: {}]   ;;  %s668_s1 = inlined_call_operand.hbm [shape: bf16[32,64], index: 1, kind: input, shape index: {}]   ;;  %s669_s2 = inlined_call_operand.vmem [shape: f32[1,64], index: 2, kind: input, shape index: {}]   ;;  %s670_s3 = inlined_call_operand.hbm [shape: bf16[64,64], index: 3, kind: input, shape index: {}]   ;;  %s671_s4 = inlined_call_operand.vmem [shape: f32[1,64], index: 4, kind: input, shape index: {}]   ;;  %s672_s5 = inlined_call_operand.hbm [shape: bf16[64,128], index: 5, kind: input, shape index: {}]   ;;  %s673_s6 = inlined_call_operand.vmem [shape: f32[1,128], index: 6, kind: input, shape index: {}]   ;;  %s674_s7 = inlined_call_operand.hbm [shape: f32[8,128], index: 7, kind: output, shape index: {}]  }
   0x1   :  { %13 = vsyncpa [#allocation6], 0 }
   0x2   :  { %14 = vsyncpa [#allocation9], 0 }
   0x3   :  { %15 = vsyncpa [#allocation4], 0  ;;  %s535_s24 = smov [#allocation5]   ;;  %s417_s28 = scalar_lea.hbm %s668_s1, 256 }
   0x4   :  { %s31_s25 = sshll.u32 %s535_s24, 4  ;;  %p418_p0 = scmp.ne.s32.totalorder %s668_s1, %s417_s28  ;;  %s32_s25 = int_to_ptr.vmem [resolvable:$true] %s31_s25 }
   0x5   :  { %p421_p1 = scmp.lt.u32.totalorder %s417_s28, %s668_s1 }
   0x7   :  { %p423_p2 = pnand %p421_p1, %p418_p0 }
   0x9   :  { %426 = shalt.err (!%p423_p2)
}
   0xa   :  { %s427_s10 = scalar_lea.vmem %s32_s25, 256  ;;  %p432_p4 = scmp.lt.s32.totalorder %s32_s25, %s32_s25 }
   0xb   :  { %p428_p3 = scmp.ne.s32.totalorder %s32_s25, %s427_s10  ;;  %p433_p5 = scmp.lt.s32.totalorder %s427_s10, %s427_s10 }
   0xd   :  { %p434_p6 = por %p433_p5, %p432_p4 }
   0xf   :  { %p435_p7 = pnand %p434_p6, %p428_p3 }
  0x11   :  { %438 = shalt.err (!%p435_p7)
}
  0x12   :  { %s536_s11 = smov 64   ;;  %s537_s12 = smov 4  }
  0x13   :  { %37 = dma.hbm_to_vmem [thread:$0]  %s668_s1, 256, %s32_s25, [#allocation6], %s536_s11, %s536_s11, %s537_s12  }
  0x14   :  { %s538_s15 = smov [#allocation2]   ;;  %s539_s17 = smov [#allocation7]  }
  0x15   :  { %s22_s16 = sshll.u32 %s538_s15, 4  ;;  %s45_s18 = sshll.u32 %s539_s17, 4  ;;  %s23_s16 = int_to_ptr.vmem [resolvable:$true] %s22_s16  ;;  %s46_s18 = int_to_ptr.vmem [resolvable:$true] %s45_s18 }
  0x16   :  { %s439_s21 = scalar_lea.hbm %s667_s0, 128 }
  0x17   :  { %p440_p8 = scmp.ne.s32.totalorder %s667_s0, %s439_s21  ;;  %p443_p9 = scmp.lt.u32.totalorder %s439_s21, %s667_s0 }
  0x19   :  { %p445_p10 = pnand %p443_p9, %p440_p8 }
  0x1b   :  { %448 = shalt.err (!%p445_p10)
}
  0x1c   :  { %s449_s1 = scalar_lea.vmem %s23_s16, 128  ;;  %p454_p12 = scmp.lt.s32.totalorder %s23_s16, %s23_s16 }
  0x1d   :  { %p450_p11 = scmp.ne.s32.totalorder %s23_s16, %s449_s1  ;;  %p455_p13 = scmp.lt.s32.totalorder %s449_s1, %s449_s1 }
  0x1f   :  { %p456_p0 = por %p455_p13, %p454_p12 }
  0x21   :  { %p457_p1 = pnand %p456_p0, %p450_p11 }
  0x23   :  { %460 = shalt.err (!%p457_p1)
}
  0x24   :  { %25 = dma.hbm_to_vmem [thread:$0]  %s667_s0, 128, %s23_s16, [#allocation3]  }
  0x25   :  { %s461_s30 = scalar_lea.hbm %s670_s3, 512 }
  0x26   :  { %p462_p2 = scmp.ne.s32.totalorder %s670_s3, %s461_s30  ;;  %p465_p3 = scmp.lt.u32.totalorder %s461_s30, %s670_s3 }
  0x28   :  { %p467_p4 = pnand %p465_p3, %p462_p2 }
  0x2a   :  { %470 = shalt.err (!%p467_p4)
}
  0x2b   :  { %s471_s14 = scalar_lea.vmem %s46_s18, 512  ;;  %p476_p6 = scmp.lt.s32.totalorder %s46_s18, %s46_s18 }
  0x2c   :  { %p472_p5 = scmp.ne.s32.totalorder %s46_s18, %s471_s14  ;;  %p477_p7 = scmp.lt.s32.totalorder %s471_s14, %s471_s14 }
  0x2e   :  { %p478_p8 = por %p477_p7, %p476_p6 }
  0x30   :  { %p479_p9 = pnand %p478_p8, %p472_p5 }
  0x32   :  { %482 = shalt.err (!%p479_p9)
}
  0x33   :  { %51 = dma.hbm_to_vmem [thread:$0]  %s670_s3, 512, %s46_s18, [#allocation6], %s536_s11, %s536_s11, %s537_s12  }
  0x34   :  { %s540_s16 = smov [#allocation8]   ;;  %s483_s21 = scalar_lea.hbm %s672_s5, 512 }
  0x35   :  { %s59_s17 = sshll.u32 %s540_s16, 4  ;;  %p484_p10 = scmp.ne.s32.totalorder %s672_s5, %s483_s21  ;;  %s60_s17 = int_to_ptr.vmem [resolvable:$true] %s59_s17 }
  0x36   :  { %p487_p11 = scmp.lt.u32.totalorder %s483_s21, %s672_s5 }
  0x38   :  { %p489_p12 = pnand %p487_p11, %p484_p10 }
  0x3a   :  { %492 = shalt.err (!%p489_p12)
}
  0x3b   :  { %s493_s1 = scalar_lea.vmem %s60_s17, 512  ;;  %p498_p0 = scmp.lt.s32.totalorder %s60_s17, %s60_s17 }
  0x3c   :  { %p494_p13 = scmp.ne.s32.totalorder %s60_s17, %s493_s1  ;;  %p499_p1 = scmp.lt.s32.totalorder %s493_s1, %s493_s1 }
  0x3e   :  { %p500_p2 = por %p499_p1, %p498_p0 }
  0x40   :  { %p501_p3 = pnand %p500_p2, %p494_p13 }
  0x42   :  { %504 = shalt.err (!%p501_p3)
}
  0x43   :  { %65 = dma.hbm_to_vmem [thread:$0]  %s672_s5, 512, %s60_s17, [#allocation9], %s536_s11, %s536_s11, %s537_s12  }
  0x44   :  { %527 = dma.done.wait [#allocation3], 128  }
  0x45   :  { %528 = vsyncadd [#allocation3], 4294967168 }
  0x46   :  { %529 = dma.done.wait [#allocation6], 768  }
  0x47   :  { %530 = vsyncadd [#allocation6], 4294966528 }
  0x48   :  { %531 = dma.done.wait [#allocation9], 512  }
  0x49   :  { %532 = vsyncadd [#allocation9], 4294966784  ;;  %v541_v0 = vmov 0.0   ;;  %vm542_vm0 = vmmov 0   ;;  %v407_v1 = vld [vmem:[#allocation5] sm:$0xff]   ;;  %v408_v2 = vld [vmem:[#allocation5 + $0x8] sm:$0xff]  }
  0x4a   :  { %366 = vmatprep.subr.bf16.mxu0 %v541_v0  ;;  %370 = vmatprep.mubr.msk.bf16.mxu0 %vm542_vm0, %v541_v0  ;;  %v81_v3 = vld [vmem:[#allocation2] sm:$0xff]  ;;  %v409_v4 = vld [vmem:[#allocation7] sm:$0xff]   ;;  %vm106_vm1 = vcmask 261120   ;;  %v411_v7 = vld [vmem:[#allocation7 + $0x10] sm:$0xff]   ;;  %vm191_vm2 = vcmask 523264   ;;  %s543_s28 = smov [#allocation10]  }
  0x4b   :  { %374 = vmatprep.subr.bf16.mxu1 %v541_v0  ;;  %382 = vmatprep.mubr.msk.bf16.mxu1 %vm542_vm0, %v541_v0  ;;  %v410_v5 = vld [vmem:[#allocation7 + $0x8] sm:$0xff]   ;;  %v82_v6 = vpack.c.bf16 %v81_v3, %v81_v3  ;;  %v412_v8 = vld [vmem:[#allocation7 + $0x18] sm:$0xff]   ;;  %v413_v9 = vld [vmem:[#allocation8] sm:$0xff]   ;;  %s326_s29 = sshll.u32 %s543_s28, 4  ;;  %s327_s29 = int_to_ptr.vmem [resolvable:$true] %s326_s29 }
  0x4c   :  { %367 = vmatpush3.bf16.msra.mxu0 %v407_v1  ;;  %375 = vmatpush3.bf16.msra.mxu1 %v409_v4  ;;  %v414_v10 = vld [vmem:[#allocation8 + $0x8] sm:$0xff]   ;;  %v415_v19 = vld [vmem:[#allocation8 + $0x10] sm:$0xff]   ;;  %v416_v20 = vld [vmem:[#allocation8 + $0x18] sm:$0xff]   ;;  %p510_p5 = scmp.lt.s32.totalorder %s327_s29, %s327_s29 }
  0x4d   :  { %368 = vmatprep.subr.bf16.mxu0 %v541_v0  ;;  %376 = vmatprep.subr.bf16.mxu1 %v541_v0  ;;  %v337_v11 = vld [vmem:[%s669_s2] ss:$0 sm:$0xff] }
  0x4e   :  { %v341_v21 = vld [vmem:[%s671_s4] ss:$0 sm:$0xff]  ;;  %s505_s4 = scalar_lea.vmem %s327_s29, 128 }
  0x4f   :  { %v347_v29 = vld [vmem:[%s673_s6] ss:$0 sm:$0xff]  ;;  %p506_p4 = scmp.ne.s32.totalorder %s327_s29, %s505_s4  ;;  %p511_p6 = scmp.lt.s32.totalorder %s505_s4, %s505_s4 }
  0x50   :  { %369 = vmatpush3.bf16.msra.mxu0 %v408_v2  ;;  %377 = vmatpush3.bf16.msra.mxu1 %v410_v5 }
  0x51   :  { %386 = vmatprep.subr.bf16.mxu0 %v541_v0  ;;  %378 = vmatprep.subr.bf16.mxu1 %v541_v0  ;;  %p512_p7 = por %p511_p6, %p510_p5 }
  0x53   :  { %371 = vmatmul.mubr.msk.bf16.vlgmr.msra.gmra.mrb[0].mxu0 %vm106_vm1, %v82_v6  ;;  %p513_p8 = pnand %p512_p7, %p506_p4 }
  0x54   :  { %394 = vmatprep.mubr.msk.bf16.mxu0 %vm542_vm0, %v541_v0  ;;  %379 = vmatpush3.bf16.msra.mxu1 %v411_v7 }
  0x55   :  { %380 = vmatprep.subr.bf16.mxu1 %v541_v0  ;;  %387 = vmatpush3.bf16.msra.mxu0 %v413_v9 }
  0x56   :  { %388 = vmatprep.subr.bf16.mxu0 %v541_v0 }
  0x58   :  { %381 = vmatpush3.bf16.msra.mxu1 %v412_v8 }
  0x59   :  { %389 = vmatpush3.bf16.msra.mxu0 %v414_v10 }
  0x5a   :  { %390 = vmatprep.subr.bf16.mxu0 %v541_v0 }
  0x5d   :  { %391 = vmatpush3.bf16.msra.mxu0 %v415_v19 }
  0x5e   :  { %392 = vmatprep.subr.bf16.mxu0 %v541_v0 }
  0x61   :  { %393 = vmatpush3.bf16.msra.mxu0 %v416_v20 }
 0x126   :  { %v144_v12 = vpop.f32.mrb[0].mxu0 }
 0x127   :  { %v145_v13 = vadd.f32 %v337_v11, %v144_v12  ;;  %v372_v14 = vpop.f32.mrb[1].mxu0 }
 0x128   :  { %v147_v15 = vpop.f32.mrb[2].mxu0 }
 0x129   :  { %v150_v16 = vmax.f32 %v145_v13, 0.0  ;;  %v373_v17 = vpop.f32.mrb[3].mxu0 }
 0x12b   :  { %v151_v18 = vpack.c.bf16 %v150_v16, %v150_v16 }
 0x12d   :  { %383 = vmatmul.mubr.msk.bf16.vlgmr.msra.gmra.mrb[0].mxu1 %vm191_vm2, %v151_v18 }
 0x200   :  { %v229_v22 = vpop.f32.mrb[0].mxu1 }
 0x201   :  { %v230_v23 = vadd.f32 %v341_v21, %v229_v22  ;;  %v384_v24 = vpop.f32.mrb[1].mxu1 }
 0x202   :  { %v232_v25 = vpop.f32.mrb[2].mxu1 }
 0x203   :  { %v235_v26 = vmax.f32 %v230_v23, 0.0  ;;  %v385_v27 = vpop.f32.mrb[3].mxu1 }
 0x205   :  { %v236_v28 = vpack.c.bf16 %v235_v26, %v235_v26 }
 0x207   :  { %395 = vmatmul.mubr.msk.bf16.vlgmr.msra.gmra.mrb[4].mxu0 %vm191_vm2, %v236_v28 }
 0x2da   :  { %v313_v30 = vpop.f32.mrb[4].mxu0 }
 0x2db   :  { %v314_v31 = vadd.f32 %v347_v29, %v313_v30  ;;  %v396_v32 = vpop.f32.mrb[5].mxu0 }
 0x2dc   :  { %v316_v33 = vpop.f32.mrb[6].mxu0 }
 0x2dd   :  { %319 = vst [vmem:[#allocation10] sm:$0xff] %v314_v31  ;;  %v397_v34 = vpop.f32.mrb[7].mxu0 }
 0x2de   :  { %516 = shalt.err (!%p513_p8)
}
 0x2df   :  { %s517_s6 = scalar_lea.hbm %s674_s7, 128 }
 0x2e0   :  { %p518_p9 = scmp.ne.s32.totalorder %s674_s7, %s517_s6  ;;  %p521_p10 = scmp.lt.u32.totalorder %s517_s6, %s674_s7 }
 0x2e2   :  { %p523_p11 = pnand %p521_p10, %p518_p9 }
 0x2e4   :  { %526 = shalt.err (!%p523_p11)
}
 0x2e5   :  { %329 = dma.vmem_to_hbm [thread:$0]  %s327_s29, 128, %s674_s7, [#allocation4]  }
 0x2e6   :  { %533 = dma.done.wait [#allocation4], 128  }
 0x2e7   :  { %534 = vsyncadd [#allocation4], 4294967168 }
 0x2e8   :  { %333 = vsyncpa [#allocation3], 1 }
 0x2e9   :  { %334 = vsyncpa [#allocation6], 1 }
 0x2ea   :  { %335 = vsyncpa [#allocation9], 1 }
 0x2eb   :  { %336 = vsyncpa [#allocation4], 1 }

</bundles_post_ra>
